<compile_context>
chip_gen: v6e
topology: v6e:2x2x1
jax: 0.10.0
libtpu: 0.0.40
codegen_flags: <defaults>
</compile_context>

<pallas_src>
import functools

import numpy as np
import jax
import jax.numpy as jnp
from jax.experimental import pallas as pl
from jax.experimental.pallas import tpu as pltpu


# ----------------------------------------------------------------------------
# Deterministic parameter construction (mirrors make_DCT_filter_anysize).
# ----------------------------------------------------------------------------
def make_dct_filter(win_size: int) -> jnp.ndarray:
    """Returns the torch-layout conv weight (K*K, 1, K, K), float32."""
    K = win_size
    f = np.zeros([K, K, 1, K * K], dtype=np.float64)
    XX, YY = np.meshgrid(range(K), range(K))
    C = np.ones(K)
    C[0] = np.sqrt(1.0 / K)
    C[1:] = np.sqrt(2.0 / K)
    for v in range(K):
        for u in range(K):
            f[:, :, 0, u + v * K] = (
                C[v] * C[u]
                * np.cos((YY + 0.5) * np.pi * v / K)
                * np.cos((XX + 0.5) * np.pi * u / K)
            )
    f = f.transpose(3, 2, 0, 1).astype(np.float32)  # (K*K, 1, K, K) == OIHW
    return jnp.asarray(f)


# ----------------------------------------------------------------------------
# Pallas kernel: lane-dense DCT projection of patch columns.
#   out_block[c, l] = sum_t W_dct[c, t] * patches_T[t, l]
# taps (t) live on sublanes (KK = 16 rows), spatial columns (l) on lanes.
# ----------------------------------------------------------------------------
def _dct_project_kernel(w_ref, p_ref, o_ref):
    # w_ref: (KK, KK)    DCT basis, row c = output channel c over the KK taps
    # p_ref: (1, KK, tn) patch columns for one image / one column tile
    # o_ref: (1, KK, tn) lane-dense output block (already NCHW-ordered)
    o_ref[0] = jnp.dot(w_ref[...], p_ref[0], preferred_element_type=jnp.float32)


def _pick_lane_tile(howo: int) -> int:
    """Largest lane-dense column tile that divides Ho*Wo; else full extent."""
    for tn in (4096, 2048, 1024, 512, 256, 128):
        if howo % tn == 0:
            return tn
    return howo  # ragged extent: single full-width block per image (allowed)


@functools.partial(jax.jit, static_argnames=("win_size", "overlapping_step"))
def dct_transform(x, dct_filter, *, win_size, overlapping_step):
    """Equivalent of dct_transform_net.forward(x) for NCHW x with C == 1."""
    N, C, H, W = x.shape
    assert C == 1, "DCT filter has a single input channel"
    K, s = win_size, overlapping_step
    Ho = (H - K) // s + 1
    Wo = (W - K) // s + 1
    KK = K * K
    HoWo = Ho * Wo

    # --- im2col (strided-slice layout glue, no FLOPs), built directly in the
    # transposed, lane-dense layout (N, KK taps, Ho*Wo): spatial on lanes.
    # Tap order t = ki*K + kj matches the DCT weight reshape below.
    # TODO(synk): fold the tap extraction into the kernel itself (needs
    # lane-strided VMEM gathers) to also drop this HBM round trip of patches.
    cols = []
    for ki in range(K):
        for kj in range(K):
            cols.append(
                jax.lax.slice(
                    x,
                    (0, 0, ki, kj),
                    (N, 1, ki + (Ho - 1) * s + 1, kj + (Wo - 1) * s + 1),
                    (1, 1, s, s),
                )
            )
    patches_t = jnp.concatenate(cols, axis=1).reshape(N, KK, HoWo)

    # W_dct[c, t] = dct_filter[c, 0, ki, kj] with tap index t = ki*K + kj.
    w_mat = dct_filter.reshape(KK, KK)

    tn = _pick_lane_tile(HoWo)
    grid = (N, HoWo // tn)

    cost = pl.CostEstimate(
        flops=2 * N * KK * KK * HoWo,
        transcendentals=0,
        bytes_accessed=4 * (2 * N * KK * HoWo + KK * KK),
    )

    out = pl.pallas_call(
        _dct_project_kernel,
        out_shape=jax.ShapeDtypeStruct((N, KK, HoWo), jnp.float32),
        grid_spec=pltpu.PrefetchScalarGridSpec(
            num_scalar_prefetch=0,
            grid=grid,
            in_specs=[
                pl.BlockSpec((KK, KK), lambda n, j: (0, 0)),     # resident basis
                pl.BlockSpec((1, KK, tn), lambda n, j: (n, 0, j)),
            ],
            out_specs=pl.BlockSpec((1, KK, tn), lambda n, j: (n, 0, j)),
        ),
        compiler_params=pltpu.CompilerParams(
            dimension_semantics=("parallel", "parallel"),
        ),
        cost_estimate=cost,
    )(w_mat, patches_t)

    # Already channel-major (NCHW): just split the fused spatial axis (free).
    return out.reshape(N, KK, Ho, Wo)


# ----------------------------------------------------------------------------
# Pure-XLA reference (exact torch conv2d semantics) for verification.
# ----------------------------------------------------------------------------
def reference_conv(x, w, stride):
    return jax.lax.conv_general_dilated(
        x, w,
        window_strides=(stride, stride),
        padding="VALID",
        dimension_numbers=("NCHW", "OIHW", "NCHW"),
    )


if __name__ == "__main__":
    win_size = 4
    overlapping_step = 2

    key = jax.random.PRNGKey(0)
    x = jax.random.normal(key, (2, 1, 16, 16), dtype=jnp.float32)

    dct_filter = make_dct_filter(win_size)          # (16, 1, 4, 4)

    y = dct_transform(x, dct_filter, win_size=win_size,
                      overlapping_step=overlapping_step)
    y = jax.block_until_ready(y)

    y_ref = reference_conv(x, dct_filter, overlapping_step)
    assert y.shape == y_ref.shape == (2, win_size * win_size, 7, 7), y.shape
    if not np.allclose(np.asarray(y), np.asarray(y_ref), rtol=1e-2, atol=1e-2):
        raise AssertionError("Pallas DCT conv does not match reference conv2d")

    print("KERNEL_OK")
</pallas_src>

<mosaic_0001>
module attributes {stable_mosaic.version = 11 : i64} {
  func.func @_dct_project_kernel(%arg0: i32, %arg1: i32, %arg2: memref<16x16xf32, #tpu.memory_space<vmem>>, %arg3: memref<1x16x49xf32, #tpu.memory_space<vmem>>, %arg4: memref<1x16x49xf32, #tpu.memory_space<vmem>>) attributes {dimension_semantics = [#tpu.dimension_semantics<parallel>, #tpu.dimension_semantics<parallel>], iteration_bounds = array<i64: 2, 1>, scalar_prefetch = 0 : i64, scratch_operands = 0 : i64, tpu.core_type = #tpu.core_type<tc>, window_params = [{pipeline_mode = #tpu.pipeline_mode<synchronous>, transform_indices = @transform_0, window_bounds = array<i64: 16, 16>}, {transform_indices = @transform_1, window_bounds = array<i64: 1, 16, 49>}, {transform_indices = @transform_2, window_bounds = array<i64: 1, 16, 49>}]} {
    %c0 = arith.constant 0 : index
    %c0_0 = arith.constant 0 : index
    %0 = vector.load %arg2[%c0, %c0_0] : memref<16x16xf32, #tpu.memory_space<vmem>>, vector<16x16xf32>
    %c0_1 = arith.constant 0 : index
    %c0_2 = arith.constant 0 : index
    %c0_3 = arith.constant 0 : index
    %1 = vector.load %arg3[%c0_1, %c0_2, %c0_3] : memref<1x16x49xf32, #tpu.memory_space<vmem>>, vector<1x16x49xf32>
    %2 = vector.shape_cast %1 : vector<1x16x49xf32> to vector<16x49xf32>
    %cst = arith.constant dense<0.000000e+00> : vector<16x49xf32>
    %3 = tpu.matmul %0, %2, %cst {dimension_numbers = #tpu.dot_dimension_numbers<[1], [0], [0], [1], [0, 0, 1, 1], [], []>} : vector<16x16xf32>, vector<16x49xf32>, vector<16x49xf32> -> vector<16x49xf32>
    %c0_4 = arith.constant 0 : index
    %c0_5 = arith.constant 0 : index
    %c0_6 = arith.constant 0 : index
    %4 = vector.load %arg4[%c0_4, %c0_5, %c0_6] : memref<1x16x49xf32, #tpu.memory_space<vmem>>, vector<1x16x49xf32>
    %5 = vector.shape_cast %4 : vector<1x16x49xf32> to vector<16x49xf32>
    %6 = vector.shape_cast %3 : vector<16x49xf32> to vector<1x16x49xf32>
    tpu.vector_store %arg4[%c0_4, %c0_5, %c0_6], %6 {strides = array<i32>} : memref<1x16x49xf32, #tpu.memory_space<vmem>>, vector<1x16x49xf32>,
    return
  }
  func.func @transform_0(%arg0: i32, %arg1: i32) -> (i32, i32) {
    %c0_i32 = arith.constant 0 : i32
    %c0_i32_0 = arith.constant 0 : i32
    %c0_i32_1 = arith.constant 0 : i32
    return %c0_i32, %c0_i32_0 : i32, i32
  }
  func.func @transform_1(%arg0: i32, %arg1: i32) -> (i32, i32, i32) {
    %c0_i32 = arith.constant 0 : i32
    %c0_i32_0 = arith.constant 0 : i32
    return %arg0, %c0_i32, %arg1 : i32, i32, i32
  }
  func.func @transform_2(%arg0: i32, %arg1: i32) -> (i32, i32, i32) {
    %c0_i32 = arith.constant 0 : i32
    %c0_i32_0 = arith.constant 0 : i32
    return %arg0, %c0_i32, %arg1 : i32, i32, i32
  }
}

</mosaic_0001>

<bundles_post_ra>
// kernel: dct_transform.1
= control target key start
LH: loop header
LB: loop body
LE: loop exit
PB: predicated region body
PF: predicated region fallthrough
CT: control target
= control target key end

     0   :  { %s436_s9 = smov 0   ;;  %s438_s10 = smov 0   ;;  %s472_s0 = inlined_call_operand.vmem [shape: f32[16,16], index: 0, kind: input, shape index: {}]   ;;  %s473_s1 = inlined_call_operand.vmem [shape: f32[2,16,49], index: 1, kind: input, shape index: {}]   ;;  %s474_s2 = inlined_call_operand.vmem [shape: f32[2,16,49], index: 2, kind: output, shape index: {}]  }
   0x1   :  { %s440_s11 = smov 0  }
   0x2 LB: > { %s24_s12 = sadd.s32 1, %s415_s10  ;;  %p351_p0 = scmp.ge.s32.totalorder %s419_s11, 1  ;;  %s419_s11 = sphi %s440_s11, %s12_s11   ;;  %s415_s10 = sphi %s438_s10, %s476_s10   ;;  %s411_s9 = sphi %s436_s9, %s475_s9  }
   0x3   : > { %p26_p1 = scmp.ge.s32.totalorder %s24_s12, 2  ;;  %p131_p2 = scmp.lt.s32.totalorder %s419_s11, 3 }
   0x5   : > { %s478_s12 = smov (%p26_p1, %s24_s12), 0  ;;  %p132_p3 = pnand %p351_p0, %p131_p2 }
   0x6   : > { %p159_p4 = scmp.lt.s32.totalorder (!%p132_p3), %s411_s9, 1 }
   0x7   : > { %135 = sbr.rel (%p132_p3) target bundleno = 216 (0xd8), region = 28 }
   0xc   : > { %v175_v0 = vld [vmem:[%s472_s0] sm:$0xff]  ;;  %vm179_vm0 = vcmask 130048   ;;  %s480_s9 = smov (!%p159_p4, %s411_s9), 1  ;;  %v176_v3 = vld [vmem:[%s472_s0 + $0x8] sm:$0xff]  ;;  %vm261_vm1 = vcmask 400384  }
   0xd   : > { %370 = vmatprep.mubr.msk.f32.mxu0 %vm179_vm0, %v175_v0  ;;  %s360_s15 = sshll.u32 %s480_s9, 4 }
   0xe   : > { %s166_s18 = scalar_lea.vmem %s473_s1, %s360_s15  ;;  %s174_s23 = scalar_lea.vmem %s474_s2, %s360_s15 }
   0xf   : > { %v178_v1 = vld [vmem:[%s166_s18 + $0x8] sm:$0xff]  ;;  %v177_v2 = vld [vmem:[%s166_s18] sm:$0xff] }
  0x10   : > { %366 = vmatprep.subr.mxu0 %v178_v1 }
  0x11   : > { %367 = vmatpush3.msra.mxu0 %v178_v1 }
  0x12   : > { %368 = vmatprep.subr.mxu0 %v177_v2 }
  0x13   : > { %369 = vmatpush3.msra.mxu0 %v177_v2 }
  0x14   : > { %371 = vmatmul.mubr.msk.f32.vlgmr.msra.gmra.mxu0 %vm179_vm0, %v176_v3 }
  0xd4   : > { %v372_v4 = vpop.f32.mrf.mxu0 }
  0xd5   : > { %263 = vst.msk [vmem:[%s174_s23 + $0x8] sm:$0xff] %vm261_vm1, %v372_v4 }
  0xd6   : > { %v252_v5 = vpop.f32.mrf.mxu0 }
  0xd7   : > { %262 = vst.msk [vmem:[%s174_s23] sm:$0xff] %vm261_vm1, %v252_v5 }
  0xd8 PF: > { %s12_s11 = sadd.s32 1, %s419_s11   ;;  %s475_s9 = smov %s415_s10 }
  0xd9   : > { %p9_p5 = scmp.ge.s32.totalorder %s12_s11, 4   ;;  %s476_s10 = smov %s478_s12 }
  0xdb   :  { %11 = sbr.rel (!%p9_p5) target bundleno = 2 (0x2), region = 58 }

</bundles_post_ra>
